<compile_context>
chip_gen: v7x
topology: tpu7x:2x2x1
jax: 0.10.0
libtpu: 0.0.40
codegen_flags: <defaults>
</compile_context>

<pallas_src>
import math
import functools

import jax
import jax.numpy as jnp
from jax import lax
from jax.experimental import pallas as pl
from jax.experimental.pallas import tpu as pltpu


_NEG_BIG = -1e30  # large negative in the f32 score domain (pre-exp)


def _round_up(x, m):
    return ((x + m - 1) // m) * m


def _cdiv(a, b):
    return -(-a // b)


def _flash_attention_kernel(valid_lens_ref,   # SMEM (B,) int32, scalar prefetch
                            q_ref,            # VMEM (1, tq, D)
                            k_ref,            # VMEM (1, tk, D)
                            v_ref,            # VMEM (1, tk, V)
                            o_ref,            # VMEM (1, tq, V)
                            m_sc,             # VMEM (tq, 1)  f32 scratch
                            l_sc,             # VMEM (tq, 1)  f32 scratch
                            acc_sc,           # VMEM (tq, V)  f32 scratch
                            *, scale, tk):
    b = pl.program_id(0)
    ki = pl.program_id(2)
    nk = pl.num_programs(2)

    @pl.when(ki == 0)
    def _init():
        m_sc[...] = jnp.full_like(m_sc, -jnp.inf)
        l_sc[...] = jnp.zeros_like(l_sc)
        acc_sc[...] = jnp.zeros_like(acc_sc)

    vl = valid_lens_ref[b]

    # Skip K tiles that lie entirely past valid_len: no MXU / exp / VPU work
    # for masked-out key ranges (DMA still streams, compute is the binder).
    @pl.when(ki * tk < vl)
    def _compute():
        # bf16 MXU operands (3x MXU throughput vs emulated f32), f32 accum.
        # 1/sqrt(d) folded into the (tq, D) query tile, not the (tq, tk)
        # scores.
        q = (q_ref[0] * jnp.asarray(scale, q_ref.dtype)).astype(jnp.bfloat16)
        k = k_ref[0].astype(jnp.bfloat16)
        v = v_ref[0].astype(jnp.bfloat16)

        # scores = q @ k^T as a contraction on D (no XLU transpose of k).
        # Kept as a local value -- no VMEM scratch round-trip.
        s = lax.dot_general(
            q, k, dimension_numbers=(((1,), (1,)), ((), ())),
            preferred_element_type=jnp.float32)               # (tq, tk) f32

        # masked_softmax: key columns >= valid_len (this also covers any
        # zero-padded key rows, since valid_len <= K <= Kp).
        col = lax.broadcasted_iota(jnp.int32, s.shape, 1) + ki * tk
        s = jnp.where(col < vl, s, _NEG_BIG)

        # Online (flash) softmax accumulation; statistics stay in f32.
        m_prev = m_sc[...]
        m_new = jnp.maximum(m_prev, jnp.max(s, axis=-1, keepdims=True))
        alpha = jnp.exp(m_prev - m_new)
        # TODO(synk): on v6e/v7x the big exp could run in bf16 (EUP bf16
        # path); kept in f32 so the same kernel stays correct/fast on v5e.
        p = jnp.exp(s - m_new)
        l_sc[...] = alpha * l_sc[...] + jnp.sum(p, axis=-1, keepdims=True)
        acc_sc[...] = alpha * acc_sc[...] + jnp.dot(
            p.astype(jnp.bfloat16), v, preferred_element_type=jnp.float32)
        m_sc[...] = m_new

    @pl.when(ki == nk - 1)
    def _finalize():
        l = l_sc[...]
        # Exact division (once per Q tile, essentially free); guard rows with
        # valid_len == 0 (fully masked) -> output 0 instead of NaN.
        inv_l = 1.0 / jnp.where(l > 0.0, l, 1.0)
        o_ref[0] = (acc_sc[...] * inv_l).astype(o_ref.dtype)


@functools.partial(jax.jit,
                   static_argnames=("scale", "tq", "tk", "vmem_limit"))
def _flash_attention_call(q, k, v, valid_lens, *, scale, tq, tk, vmem_limit):
    B, Qp, D = q.shape
    _, Kp, _ = k.shape
    V = v.shape[-1]

    grid = (B, Qp // tq, Kp // tk)
    kernel = functools.partial(_flash_attention_kernel, scale=scale, tk=tk)

    grid_spec = pltpu.PrefetchScalarGridSpec(
        num_scalar_prefetch=1,
        grid=grid,
        in_specs=[
            pl.BlockSpec((1, tq, D), lambda b, qi, ki, vl: (b, qi, 0)),
            # When tk == Kp the K/V block index is invariant across qi steps
            # -> Pallas skips the re-DMA (K/V stay resident in VMEM).
            pl.BlockSpec((1, tk, D), lambda b, qi, ki, vl: (b, ki, 0)),
            pl.BlockSpec((1, tk, V), lambda b, qi, ki, vl: (b, ki, 0)),
        ],
        out_specs=pl.BlockSpec((1, tq, V), lambda b, qi, ki, vl: (b, qi, 0)),
        scratch_shapes=[
            pltpu.VMEM((tq, 1), jnp.float32),    # running max m
            pltpu.VMEM((tq, 1), jnp.float32),    # running sum l
            pltpu.VMEM((tq, V), jnp.float32),    # output accumulator
        ],
    )

    return pl.pallas_call(
        kernel,
        out_shape=jax.ShapeDtypeStruct((B, Qp, V), q.dtype),
        grid_spec=grid_spec,
        compiler_params=pltpu.CompilerParams(
            dimension_semantics=("parallel", "parallel", "arbitrary"),
            vmem_limit_bytes=vmem_limit),
    )(valid_lens, q, k, v)


def dot_product_attention(queries, keys, values, valid_lens=None, *,
                          tq_max=512, tk_max=512):
    """Pallas equivalent of DotProductAttention.forward (eval/inference).

    Returns the attended output (B, Q, V)."""
    B, Q, D = queries.shape
    _, K, _ = keys.shape
    V = values.shape[-1]

    if valid_lens is None:
        # Any zero-padded key rows (if K gets padded below) must still be
        # masked out -> default to the *original* K.
        valid_lens = jnp.full((B,), K, dtype=jnp.int32)
    else:
        valid_lens = valid_lens.astype(jnp.int32)

    scale = 1.0 / math.sqrt(float(D))   # scale by the *original* d
    itemsize = jnp.dtype(queries.dtype).itemsize

    # --- K tile: keep K/V resident in VMEM when the double-buffered K/V
    # tiles fit a budget that is safe on every generation (v7x has only
    # 64 MiB physical VMEM per TensorCore), otherwise tile K. ---
    resident_kv_bytes = 2 * K * (D + V) * itemsize
    resident = (resident_kv_bytes <= (12 << 20)) and (K <= tk_max)
    if resident:
        Kp = _round_up(K, 8)
        tk = Kp
    else:
        n_k = _cdiv(K, tk_max)
        tk = _round_up(_cdiv(K, n_k), 128)   # lane-dense score tiles
        Kp = _round_up(K, tk)

    # --- Q tile: large tiles reduce K/V re-streaming; only pad Q to the
    # 8-row sublane granularity it actually needs. ---
    if Q <= tq_max:
        Qp = _round_up(Q, 8)
        tq = Qp
    else:
        n_q = _cdiv(Q, tq_max)
        tq = _round_up(_cdiv(Q, n_q), 8)
        Qp = _round_up(Q, tq)
    # v7x has 2 TensorCores: make sure there are >= 2 parallel grid programs.
    if B * (Qp // tq) < 2 and Q >= 16:
        tq = _round_up(_cdiv(Q, 2), 8)
        Qp = _round_up(Q, tq)

    # Only pad the sequence dims that need it; D and V stay unpadded (a
    # full-extent last dim is a legal BlockSpec even when < 128), so for the
    # common case there is no extra HBM pass from jnp.pad at all.
    q = queries if Qp == Q else jnp.pad(queries, ((0, 0), (0, Qp - Q), (0, 0)))
    k = keys if Kp == K else jnp.pad(keys, ((0, 0), (0, Kp - K), (0, 0)))
    v = values if Kp == K else jnp.pad(values, ((0, 0), (0, Kp - K), (0, 0)))

    # Scoped-VMEM limit sized from the actual tile set (double-buffered
    # q/k/v/o tiles + f32 scratch), capped below v7x's 64 MiB physical VMEM.
    tile_bytes = (2 * (tq * D + tk * D + tk * V + tq * V) * itemsize
                  + 4 * tq * (V + 2))
    vmem_limit = int(min(max(4 * tile_bytes, 32 << 20), 56 << 20))

    out = _flash_attention_call(q, k, v, valid_lens, scale=scale,
                                tq=tq, tk=tk, vmem_limit=vmem_limit)
    return out if Qp == Q else out[:, :Q, :]


def _reference(queries, keys, values, valid_lens=None):
    d = queries.shape[-1]
    scores = jnp.einsum("bqd,bkd->bqk", queries, keys) / math.sqrt(d)
    if valid_lens is not None:
        col = jnp.arange(keys.shape[1])[None, None, :]
        mask = col < valid_lens[:, None, None]
        scores = jnp.where(mask, scores, -1e6)
    w = jax.nn.softmax(scores, axis=-1)
    return jnp.einsum("bqk,bkv->bqv", w, values)


if __name__ == "__main__":
    key = jax.random.PRNGKey(0)
    kq, kk, kv = jax.random.split(key, 3)

    # bf16 MXU operands (f32 accumulation) -> tolerance relaxed vs pure f32.
    TOL = dict(atol=2e-2, rtol=2e-2)

    # --- test 1: small shapes, resident K/V, with and without valid_lens ---
    B, Q, K, D, V = 2, 8, 8, 32, 32
    queries = jax.random.normal(kq, (B, Q, D), dtype=jnp.float32)
    keys = jax.random.normal(kk, (B, K, D), dtype=jnp.float32)
    values = jax.random.normal(kv, (B, K, V), dtype=jnp.float32)
    valid_lens = jnp.array([3, 6], dtype=jnp.int32)

    out = jax.block_until_ready(
        dot_product_attention(queries, keys, values, valid_lens))
    ref_out = _reference(queries, keys, values, valid_lens)
    assert jnp.allclose(out, ref_out, **TOL)

    out2 = jax.block_until_ready(
        dot_product_attention(queries, keys, values, None))
    ref_out2 = _reference(queries, keys, values, None)
    assert jnp.allclose(out2, ref_out2, **TOL)

    # --- test 2: multiple Q and K tiles, mask spanning tiles, skipped tiles,
    # Q/K padding ---
    kq2, kk2, kv2 = jax.random.split(jax.random.PRNGKey(1), 3)
    B2, Q2, K2, D2, V2 = 2, 40, 300, 32, 32
    q2 = jax.random.normal(kq2, (B2, Q2, D2), dtype=jnp.float32)
    k2 = jax.random.normal(kk2, (B2, K2, D2), dtype=jnp.float32)
    v2 = jax.random.normal(kv2, (B2, K2, V2), dtype=jnp.float32)
    vl2 = jnp.array([300, 120], dtype=jnp.int32)

    out3 = jax.block_until_ready(
        dot_product_attention(q2, k2, v2, vl2, tq_max=16, tk_max=128))
    ref_out3 = _reference(q2, k2, v2, vl2)
    assert jnp.allclose(out3, ref_out3, **TOL)

    # --- test 3: default tiling on the larger shapes (resident K/V path) ---
    out4 = jax.block_until_ready(dot_product_attention(q2, k2, v2, vl2))
    assert jnp.allclose(out4, ref_out3, **TOL)

    print("KERNEL_OK")
</pallas_src>

<mosaic_0001>
module attributes {stable_mosaic.version = 11 : i64} {
  func.func @_flash_attention_kernel(%arg0: i32, %arg1: i32, %arg2: i32, %arg3: memref<2xi32, #tpu.memory_space<smem>>, %arg4: memref<1x8x32xf32, #tpu.memory_space<vmem>>, %arg5: memref<1x8x32xf32, #tpu.memory_space<vmem>>, %arg6: memref<1x8x32xf32, #tpu.memory_space<vmem>>, %arg7: memref<1x8x32xf32, #tpu.memory_space<vmem>>, %arg8: memref<8x1xf32, #tpu.memory_space<vmem>>, %arg9: memref<8x1xf32, #tpu.memory_space<vmem>>, %arg10: memref<8x32xf32, #tpu.memory_space<vmem>>) attributes {dimension_semantics = [#tpu.dimension_semantics<parallel>, #tpu.dimension_semantics<parallel>, #tpu.dimension_semantics<arbitrary>], iteration_bounds = array<i64: 2, 1, 1>, scalar_prefetch = 1 : i64, scratch_operands = 3 : i64, tpu.core_type = #tpu.core_type<tc>, window_params = [{transform_indices = @transform_0, window_bounds = array<i64: 1, 8, 32>}, {transform_indices = @transform_1, window_bounds = array<i64: 1, 8, 32>}, {transform_indices = @transform_2, window_bounds = array<i64: 1, 8, 32>}, {transform_indices = @transform_3, window_bounds = array<i64: 1, 8, 32>}]} {
    %c0_i32 = arith.constant 0 : i32
    %0 = arith.cmpi eq, %arg2, %c0_i32 : i32
    %1 = arith.extui %0 : i1 to i32
    %c0_i32_0 = arith.constant 0 : i32
    %2 = arith.cmpi ne, %1, %c0_i32_0 : i32
    scf.if %2 {
      %cst = arith.constant 0xFF800000 : f32
      %12 = vector.broadcast %cst : f32 to vector<8x1xf32>
      %c0 = arith.constant 0 : index
      %c0_4 = arith.constant 0 : index
      %13 = vector.load %arg8[%c0, %c0_4] : memref<8x1xf32, #tpu.memory_space<vmem>>, vector<8x1xf32>
      tpu.vector_store %arg8[%c0, %c0_4], %12 {strides = array<i32>} : memref<8x1xf32, #tpu.memory_space<vmem>>, vector<8x1xf32>,
      %cst_5 = arith.constant 0.000000e+00 : f32
      %14 = vector.broadcast %cst_5 : f32 to vector<8x1xf32>
      %c0_6 = arith.constant 0 : index
      %c0_7 = arith.constant 0 : index
      %15 = vector.load %arg9[%c0_6, %c0_7] : memref<8x1xf32, #tpu.memory_space<vmem>>, vector<8x1xf32>
      tpu.vector_store %arg9[%c0_6, %c0_7], %14 {strides = array<i32>} : memref<8x1xf32, #tpu.memory_space<vmem>>, vector<8x1xf32>,
      %cst_8 = arith.constant 0.000000e+00 : f32
      %16 = vector.broadcast %cst_8 : f32 to vector<8x32xf32>
      %c0_9 = arith.constant 0 : index
      %c0_10 = arith.constant 0 : index
      %17 = vector.load %arg10[%c0_9, %c0_10] : memref<8x32xf32, #tpu.memory_space<vmem>>, vector<8x32xf32>
      tpu.vector_store %arg10[%c0_9, %c0_10], %16 {strides = array<i32>} : memref<8x32xf32, #tpu.memory_space<vmem>>, vector<8x32xf32>,
    } else {
    }
    %3 = arith.index_cast %arg0 : i32 to index
    %4 = memref.load %arg3[%3] : memref<2xi32, #tpu.memory_space<smem>>
    %c8_i32 = arith.constant 8 : i32
    %5 = arith.muli %arg2, %c8_i32 : i32
    %6 = arith.cmpi slt, %5, %4 : i32
    %7 = arith.extui %6 : i1 to i32
    %c0_i32_1 = arith.constant 0 : i32
    %8 = arith.cmpi ne, %7, %c0_i32_1 : i32
    scf.if %8 {
      %c0 = arith.constant 0 : index
      %c0_4 = arith.constant 0 : index
      %c0_5 = arith.constant 0 : index
      %12 = vector.load %arg4[%c0, %c0_4, %c0_5] : memref<1x8x32xf32, #tpu.memory_space<vmem>>, vector<1x8x32xf32>
      %13 = vector.shape_cast %12 : vector<1x8x32xf32> to vector<8x32xf32>
      %cst = arith.constant 0.176776692 : f32
      %14 = vector.broadcast %cst : f32 to vector<8x32xf32>
      %15 = arith.mulf %13, %14 : vector<8x32xf32>
      %16 = arith.truncf %15 : vector<8x32xf32> to vector<8x32xbf16>
      %c0_6 = arith.constant 0 : index
      %c0_7 = arith.constant 0 : index
      %c0_8 = arith.constant 0 : index
      %17 = vector.load %arg5[%c0_6, %c0_7, %c0_8] : memref<1x8x32xf32, #tpu.memory_space<vmem>>, vector<1x8x32xf32>
      %18 = vector.shape_cast %17 : vector<1x8x32xf32> to vector<8x32xf32>
      %19 = arith.truncf %18 : vector<8x32xf32> to vector<8x32xbf16>
      %c0_9 = arith.constant 0 : index
      %c0_10 = arith.constant 0 : index
      %c0_11 = arith.constant 0 : index
      %20 = vector.load %arg6[%c0_9, %c0_10, %c0_11] : memref<1x8x32xf32, #tpu.memory_space<vmem>>, vector<1x8x32xf32>
      %21 = vector.shape_cast %20 : vector<1x8x32xf32> to vector<8x32xf32>
      %22 = arith.truncf %21 : vector<8x32xf32> to vector<8x32xbf16>
      %cst_12 = arith.constant dense<0.000000e+00> : vector<8x8xf32>
      %23 = tpu.matmul %16, %19, %cst_12 {dimension_numbers = #tpu.dot_dimension_numbers<[1], [1], [0], [0], [0, 0, 1, 0], [], []>} : vector<8x32xbf16>, vector<8x32xbf16>, vector<8x8xf32> -> vector<8x8xf32>
      %24 = tpu.iota {dimensions = array<i32: 1>} : vector<8x8xi32>
      %c8_i32_13 = arith.constant 8 : i32
      %25 = arith.muli %arg2, %c8_i32_13 : i32
      %26 = vector.broadcast %25 : i32 to vector<8x8xi32>
      %27 = arith.addi %24, %26 : vector<8x8xi32>
      %28 = vector.broadcast %4 : i32 to vector<8x8xi32>
      %29 = arith.cmpi slt, %27, %28 : vector<8x8xi32>
      %cst_14 = arith.constant -1.000000e+30 : f32
      %30 = vector.broadcast %cst_14 : f32 to vector<8x8xf32>
      %31 = arith.select %29, %23, %30 : vector<8x8xi1>, vector<8x8xf32>
      %c0_15 = arith.constant 0 : index
      %c0_16 = arith.constant 0 : index
      %32 = vector.load %arg8[%c0_15, %c0_16] : memref<8x1xf32, #tpu.memory_space<vmem>>, vector<8x1xf32>
      %cst_17 = arith.constant dense<0xFF800000> : vector<8xf32>
      %33 = vector.multi_reduction <maximumf>, %31, %cst_17 [1] : vector<8x8xf32> to vector<8xf32>
      %34 = vector.shape_cast %33 : vector<8xf32> to vector<8x1xf32>
      %35 = arith.maximumf %32, %34 : vector<8x1xf32>
      %36 = arith.subf %32, %35 : vector<8x1xf32>
      %37 = math.exp %36 : vector<8x1xf32>
      %38 = vector.broadcast %35 : vector<8x1xf32> to vector<8x8xf32>
      %39 = arith.subf %31, %38 : vector<8x8xf32>
      %40 = math.exp %39 : vector<8x8xf32>
      %c0_18 = arith.constant 0 : index
      %c0_19 = arith.constant 0 : index
      %41 = vector.load %arg9[%c0_18, %c0_19] : memref<8x1xf32, #tpu.memory_space<vmem>>, vector<8x1xf32>
      %42 = arith.mulf %37, %41 : vector<8x1xf32>
      %cst_20 = arith.constant dense<0.000000e+00> : vector<8xf32>
      %43 = vector.multi_reduction <add>, %40, %cst_20 [1] : vector<8x8xf32> to vector<8xf32>
      %44 = vector.shape_cast %43 : vector<8xf32> to vector<8x1xf32>
      %45 = arith.addf %42, %44 : vector<8x1xf32>
      %c0_21 = arith.constant 0 : index
      %c0_22 = arith.constant 0 : index
      %46 = vector.load %arg9[%c0_21, %c0_22] : memref<8x1xf32, #tpu.memory_space<vmem>>, vector<8x1xf32>
      tpu.vector_store %arg9[%c0_21, %c0_22], %45 {strides = array<i32>} : memref<8x1xf32, #tpu.memory_space<vmem>>, vector<8x1xf32>,
      %c0_23 = arith.constant 0 : index
      %c0_24 = arith.constant 0 : index
      %47 = vector.load %arg10[%c0_23, %c0_24] : memref<8x32xf32, #tpu.memory_space<vmem>>, vector<8x32xf32>
      %48 = vector.broadcast %37 : vector<8x1xf32> to vector<8x32xf32>
      %49 = arith.mulf %48, %47 : vector<8x32xf32>
      %50 = arith.truncf %40 : vector<8x8xf32> to vector<8x8xbf16>
      %cst_25 = arith.constant dense<0.000000e+00> : vector<8x32xf32>
      %51 = tpu.matmul %50, %22, %cst_25 {dimension_numbers = #tpu.dot_dimension_numbers<[1], [0], [0], [1], [0, 0, 1, 1], [], []>} : vector<8x8xbf16>, vector<8x32xbf16>, vector<8x32xf32> -> vector<8x32xf32>
      %52 = arith.addf %49, %51 : vector<8x32xf32>
      %c0_26 = arith.constant 0 : index
      %c0_27 = arith.constant 0 : index
      %53 = vector.load %arg10[%c0_26, %c0_27] : memref<8x32xf32, #tpu.memory_space<vmem>>, vector<8x32xf32>
      tpu.vector_store %arg10[%c0_26, %c0_27], %52 {strides = array<i32>} : memref<8x32xf32, #tpu.memory_space<vmem>>, vector<8x32xf32>,
      %c0_28 = arith.constant 0 : index
      %c0_29 = arith.constant 0 : index
      %54 = vector.load %arg8[%c0_28, %c0_29] : memref<8x1xf32, #tpu.memory_space<vmem>>, vector<8x1xf32>
      tpu.vector_store %arg8[%c0_28, %c0_29], %35 {strides = array<i32>} : memref<8x1xf32, #tpu.memory_space<vmem>>, vector<8x1xf32>,
    } else {
    }
    %c0_i32_2 = arith.constant 0 : i32
    %9 = arith.cmpi eq, %arg2, %c0_i32_2 : i32
    %10 = arith.extui %9 : i1 to i32
    %c0_i32_3 = arith.constant 0 : i32
    %11 = arith.cmpi ne, %10, %c0_i32_3 : i32
    scf.if %11 {
      %c0 = arith.constant 0 : index
      %c0_4 = arith.constant 0 : index
      %12 = vector.load %arg9[%c0, %c0_4] : memref<8x1xf32, #tpu.memory_space<vmem>>, vector<8x1xf32>
      %cst = arith.constant 0.000000e+00 : f32
      %13 = vector.broadcast %cst : f32 to vector<8x1xf32>
      %14 = arith.cmpf ogt, %12, %13 : vector<8x1xf32>
      %cst_5 = arith.constant 1.000000e+00 : f32
      %15 = vector.broadcast %cst_5 : f32 to vector<8x1xf32>
      %16 = arith.select %14, %12, %15 : vector<8x1xi1>, vector<8x1xf32>
      %cst_6 = arith.constant 1.000000e+00 : f32
      %17 = vector.broadcast %cst_6 : f32 to vector<8x1xf32>
      %18 = arith.divf %17, %16 : vector<8x1xf32>
      %c0_7 = arith.constant 0 : index
      %c0_8 = arith.constant 0 : index
      %19 = vector.load %arg10[%c0_7, %c0_8] : memref<8x32xf32, #tpu.memory_space<vmem>>, vector<8x32xf32>
      %20 = vector.broadcast %18 : vector<8x1xf32> to vector<8x32xf32>
      %21 = arith.mulf %19, %20 : vector<8x32xf32>
      %c0_9 = arith.constant 0 : index
      %c0_10 = arith.constant 0 : index
      %c0_11 = arith.constant 0 : index
      %22 = vector.load %arg7[%c0_9, %c0_10, %c0_11] : memref<1x8x32xf32, #tpu.memory_space<vmem>>, vector<1x8x32xf32>
      %23 = vector.shape_cast %22 : vector<1x8x32xf32> to vector<8x32xf32>
      %24 = vector.shape_cast %21 : vector<8x32xf32> to vector<1x8x32xf32>
      tpu.vector_store %arg7[%c0_9, %c0_10, %c0_11], %24 {strides = array<i32>} : memref<1x8x32xf32, #tpu.memory_space<vmem>>, vector<1x8x32xf32>,
    } else {
    }
    return
  }
  func.func @transform_0(%arg0: i32, %arg1: i32, %arg2: i32, %arg3: memref<2xi32, #tpu.memory_space<smem>>) -> (i32, i32, i32) {
    %c0_i32 = arith.constant 0 : i32
    %c0_i32_0 = arith.constant 0 : i32
    return %arg0, %arg1, %c0_i32 : i32, i32, i32
  }
  func.func @transform_1(%arg0: i32, %arg1: i32, %arg2: i32, %arg3: memref<2xi32, #tpu.memory_space<smem>>) -> (i32, i32, i32) {
    %c0_i32 = arith.constant 0 : i32
    %c0_i32_0 = arith.constant 0 : i32
    return %arg0, %arg2, %c0_i32 : i32, i32, i32
  }
  func.func @transform_2(%arg0: i32, %arg1: i32, %arg2: i32, %arg3: memref<2xi32, #tpu.memory_space<smem>>) -> (i32, i32, i32) {
    %c0_i32 = arith.constant 0 : i32
    %c0_i32_0 = arith.constant 0 : i32
    return %arg0, %arg2, %c0_i32 : i32, i32, i32
  }
  func.func @transform_3(%arg0: i32, %arg1: i32, %arg2: i32, %arg3: memref<2xi32, #tpu.memory_space<smem>>) -> (i32, i32, i32) {
    %c0_i32 = arith.constant 0 : i32
    %c0_i32_0 = arith.constant 0 : i32
    return %arg0, %arg1, %c0_i32 : i32, i32, i32
  }
}

</mosaic_0001>

<bundles_post_ra>
// kernel: _flash_attention_call.1
= control target key start
LH: loop header
LB: loop body
LE: loop exit
PB: predicated region body
PF: predicated region fallthrough
CT: control target
= control target key end

     0   :  { %s1255_s0 = inlined_call_operand.vmem [shape: s32[2], index: 0, kind: input, shape index: {}]   ;;  %s1256_s1 = inlined_call_operand.hbm [shape: f32[2,8,32], index: 1, kind: input, shape index: {}]   ;;  %s1257_s2 = inlined_call_operand.hbm [shape: f32[2,8,32], index: 2, kind: input, shape index: {}]   ;;  %s1258_s3 = inlined_call_operand.hbm [shape: f32[2,8,32], index: 3, kind: input, shape index: {}]   ;;  %s1259_s4 = inlined_call_operand.hbm [shape: f32[2,8,32], index: 4, kind: output, shape index: {}]  }
   0x1   :  { %1265 = sst [smem:[#allocation21_spill]] %s1257_s2  ;;  %s9_s17 = sshll.u32 %s1255_s0, 4  ;;  %s10_s17 = int_to_ptr.vmem [resolvable:$true] %s9_s17 }
   0x2   :  { %s741_s18 = scalar_lea.vmem %s10_s17, 16  ;;  %p746_p1 = scmp.lt.s32.totalorder %s10_s17, %s10_s17 }
   0x3   :  { %p742_p0 = scmp.ne.s32.totalorder %s10_s17, %s741_s18  ;;  %p747_p2 = scmp.lt.s32.totalorder %s741_s18, %s741_s18 }
   0x5   :  { %p748_p3 = por %p747_p2, %p746_p1 }
   0x7   :  { %p749_p4 = pnand %p748_p3, %p742_p0 }
   0x9   :  { %752 = shalt.err (!%p749_p4)  }
   0xa   :  { %s933_s19 = smov [#allocation6]  }
   0xb   :  { %12 = dma.vmem_to_smem %s10_s17, 16, %s933_s19, [#allocation5] }
   0xc   :  { %895 = dma.done.wait [#allocation5], 16 }
   0xd   :  { %896 = vsyncadd [#allocation5], 4294967280 }
   0xe   :  { %14 = sfence }
   0xf   :  { %15 = vsyncpa [#allocation8], 0 }
  0x10   :  { %17 = vsyncpa [#allocation8 + $0x1], 0 }
  0x11   :  { %18 = vsyncpa [#allocation11], 0 }
  0x12   :  { %20 = vsyncpa [#allocation11 + $0x1], 0 }
  0x13   :  { %21 = vsyncpa [#allocation9], 0 }
  0x14   :  { %23 = vsyncpa [#allocation9 + $0x1], 0  ;;  %s972_s0 = smov 0   ;;  %s974_s20 = smov 0  }
  0x15   :  { %s976_s21 = smov 0   ;;  %s978_s22 = smov 0  }
  0x16   :  { %s980_s23 = smov 0   ;;  %s982_s24 = smov 0  }
  0x17 LB: > { %1266 = sst [smem:[#allocation18_spill]] %s927_s23  ;;  %s1003_s25 = sadd.s32 4294967295, %s931_s24   ;;  %s931_s24 = sphi %s982_s24, %s29_s24   ;;  %s927_s23 = sphi %s980_s23, %s1287_s23   ;;  %s923_s22 = sphi %s978_s22, %s1286_s22   ;;  %s919_s21 = sphi %s976_s21, %s1290_s21   ;;  %s915_s20 = sphi %s974_s20, %s1289_s20   ;;  %s911_s0 = sphi %s972_s0, %s1288_s0  }
  0x18   : > { %s615_s26 = sadd.s32 4294967294, %s931_s24   ;;  %s48_s27 = sadd.s32 1, %s927_s23 }
  0x19   : > { %s57_s28 = sadd.s32 1, %s919_s21  ;;  %p50_p5 = scmp.ge.s32.totalorder %s48_s27, 2 }
  0x1a   : > { %p64_p6 = scmp.ne.s32.totalorder %s919_s21, %s915_s20  ;;  %p65_p7 = scmp.eq.s32.totalorder %s931_s24, 0 }
  0x1b   : > { %p70_p8 = scmp.ne.s32.totalorder %s915_s20, %s911_s0  ;;  %s1292_s27 = smov (%p50_p5, %s48_s27), 0 }
  0x1c   : > { %1267 = sst [smem:[#allocation19_spill]] %s1292_s27  ;;  %p1015_p9 = por %p65_p7, %p64_p6 }
  0x1d   : > { %p71_p10 = scmp.eq.s32.totalorder %s1003_s25, 0  ;;  %s52_s30 = ssub.s32 %s927_s23, %s1292_s27 }
  0x1e   : > { %p152_p11 = scmp.eq.s32.totalorder %s1003_s25, 1  ;;  %p55_p12 = scmp.eq.s32.totalorder %s52_s30, 0 }
  0x1f   : > { %p1023_p13 = por %p71_p10, %p70_p8  ;;  %p158_p1 = scmp.eq.s32.totalorder %s615_s26, 1 }
  0x20   : > { %p1027_p0 = por %p152_p11, %p64_p6  ;;  %p675_p4 = scmp.lt.s32.totalorder %s931_s24, 2 }
  0x21   : > { %s1269_s5 = scalar_select %p1023_p13, 1, 0 }
  0x22   : > { %s1270_s6 = scalar_select %p1027_p0, 1, 0 }
  0x23   : > { %s1032_s7 = scalar_select %p55_p12, %s919_s21, %s57_s28  }
  0x24   : > { %p1034_p2 = por %p158_p1, %p70_p8  ;;  %s178_s9 = sand.u32 1, %s919_s21  }
  0x25   : > { %1271 = sst [smem:[#allocation20_spill]] %s1032_s7  ;;  %s1043_s10 = sshll.u32 %s178_s9, 3 }
  0x26   : > { %s1272_s8 = scalar_select %p1034_p2, 1, 0 }
  0x27   : > { %s1046_s11 = sshll.u32 %s927_s23, 7  ;;  %p1050_p5 = pnand %p675_p4, %p1015_p9 }
  0x28   : > { %s197_s13 = sand.u32 1, %s931_s24   ;;  %s1274_s2 = sld [smem:[#allocation21_spill]] }
  0x29   : > { %s1273_s12 = scalar_select %p1050_p5, 1, 0 }
  0x2a   : > { %s201_s17 = scalar_lea.vmem [#allocation10], %s1043_s10  ;;  %s1066_s19 = scalar_lea.sflag [#allocation11], %s197_s13 }
  0x2b   : > { %s209_s18 = sshll.u32 %s201_s17, 4  ;;  %p1072_p9 = pneg %p1050_p5  ;;  %s1063_s18 = int_to_ptr.vmem [resolvable:$true] %s209_s18 }
  0x2e   : > { %s1059_s16 = scalar_lea.hbm %s1274_s2, %s1046_s11  ;;  %s758_s14 = scalar_lea.hbm %s1274_s2, 256 }
  0x2f   : > { %s753_s26 = scalar_lea.hbm %s1059_s16, 128  ;;  %p759_p12 = scmp.lt.u32.totalorder %s1059_s16, %s1274_s2 }
  0x30   : > { %p754_p8 = scmp.ne.s32.totalorder %s1059_s16, %s753_s26  ;;  %p760_p1 = scmp.lt.u32.totalorder %s758_s14, %s753_s26 }
  0x31   : > { %p762_p3 = scmp.lt.u32.totalorder %s753_s26, %s1059_s16 }
  0x32   : > { %p756_p10 = pnand %p1072_p9, %p754_p8  ;;  %p761_p4 = por %p760_p1, %p759_p12 }
  0x34   : > { %p757_p11 = pneg %p756_p10  ;;  %p763_p6 = por %p762_p3, %p761_p4 }
  0x36   : > { %p764_p7 = pnand %p763_p6, %p757_p11 }
  0x38   : > { %767 = shalt.err (!%p764_p7)
}
  0x39   : > { %s768_s13 = scalar_lea.vmem %s1063_s18, 128  ;;  %s934_s29 = smov [#allocation10]  }
  0x3a   : > { %p769_p8 = scmp.ne.s32.totalorder %s1063_s18, %s768_s13  ;;  %s773_s30 = sshll.u32 %s934_s29, 4  ;;  %s774_s30 = int_to_ptr.vmem [resolvable:$false] %s773_s30 }
  0x3b   : > { %s775_s15 = scalar_lea.vmem %s774_s30, 256  ;;  %p776_p0 = scmp.lt.s32.totalorder %s1063_s18, %s774_s30 }
  0x3c   : > { %p771_p10 = pnand %p769_p8, %p1072_p9  ;;  %p777_p13 = scmp.lt.s32.totalorder %s775_s15, %s768_s13 }
  0x3e   : > { %p772_p2 = pneg %p771_p10  ;;  %p778_p12 = por %p777_p13, %p776_p0 }
  0x40   : > { %p779_p1 = pnand %p778_p12, %p772_p2 }
  0x42   : > { %782 = shalt.err (!%p779_p1)
}
  0x43   : > { %667 = dma.hbm_to_vmem [thread:$0]  (!%p1050_p5), %s1059_s16, 128, %s1063_s18, %s1066_s19  }
  0x44   : > { %p1276_p3 = scmp.lt.s32.totalorder %s931_s24, 3  ;;  %p1277_p6 = scmp.ge.s32.totalorder %s931_s24, 1 }
  0x45   : > { %s1108_s13 = scalar_lea.hbm %s1256_s1, %s1046_s11  ;;  %s182_s29 = scalar_lea.vmem [#allocation7], %s1043_s10 }
  0x46   : > { %p1100_p7 = pnand %p1277_p6, %p1276_p3  ;;  %s190_s30 = sshll.u32 %s182_s29, 4  ;;  %s1111_s30 = int_to_ptr.vmem [resolvable:$true] %s190_s30 }
  0x47   : > { %s1117_s15 = scalar_lea.hbm %s1258_s3, %s1046_s11  ;;  %s179_s2 = scalar_lea.sflag [#allocation8], %s178_s9 }
  0x48   : > { %s1278_s26 = scalar_select %p1100_p7, 1, 0 }
  0x49   : > { %s783_s27 = scalar_lea.hbm %s1108_s13, 128  ;;  %s788_s23 = scalar_lea.hbm %s1256_s1, 256 }
  0x4a   : > { %p784_p13 = scmp.ne.s32.totalorder %s1108_s13, %s783_s27  ;;  %p789_p11 = scmp.lt.u32.totalorder %s1108_s13, %s1256_s1 }
  0x4b   : > { %p790_p4 = scmp.lt.u32.totalorder %s788_s23, %s783_s27  ;;  %p792_p10 = scmp.lt.u32.totalorder %s783_s27, %s1108_s13 }
  0x4c   : > { %p786_p0 = pnand %p784_p13, %p1072_p9 }
  0x4d   : > { %p791_p8 = por %p790_p4, %p789_p11 }
  0x4e   : > { %p787_p2 = pneg %p786_p0 }
  0x4f   : > { %p793_p12 = por %p792_p10, %p791_p8 }
  0x51   : > { %p794_p1 = pnand %p793_p12, %p787_p2 }
  0x53   : > { %797 = shalt.err (!%p794_p1)
}
  0x54   : > { %s798_s9 = scalar_lea.vmem %s1111_s30, 128  ;;  %s935_s11 = smov [#allocation7]  }
  0x55   : > { %p799_p3 = scmp.ne.s32.totalorder %s1111_s30, %s798_s9  ;;  %s803_s16 = sshll.u32 %s935_s11, 4  ;;  %s804_s16 = int_to_ptr.vmem [resolvable:$false] %s803_s16 }
  0x56   : > { %s805_s7 = scalar_lea.vmem %s804_s16, 256  ;;  %p806_p0 = scmp.lt.s32.totalorder %s1111_s30, %s804_s16 }
  0x57   : > { %p801_p6 = pnand %p799_p3, %p1072_p9  ;;  %p807_p7 = scmp.lt.s32.totalorder %s805_s7, %s798_s9 }
  0x59   : > { %p802_p13 = pneg %p801_p6  ;;  %p808_p11 = por %p807_p7, %p806_p0 }
  0x5b   : > { %p809_p4 = pnand %p808_p11, %p802_p13 }
  0x5d   : > { %812 = shalt.err (!%p809_p4)
}
  0x5e   : > { %664 = dma.hbm_to_vmem [thread:$0]  (!%p1050_p5), %s1108_s13, 128, %s1111_s30, %s179_s2  }
  0x5f   : > { %s220_s23 = scalar_lea.vmem [#allocation12], %s1043_s10  ;;  %s813_s18 = scalar_lea.hbm %s1117_s15, 128 }
  0x60   : > { %s228_s27 = sshll.u32 %s220_s23, 4  ;;  %p814_p2 = scmp.ne.s32.totalorder %s1117_s15, %s813_s18  ;;  %s229_s27 = int_to_ptr.vmem [resolvable:$true] %s228_s27 }
  0x61   : > { %s818_s29 = scalar_lea.hbm %s1258_s3, 256  ;;  %p819_p10 = scmp.lt.u32.totalorder %s1117_s15, %s1258_s3 }
  0x62   : > { %p816_p7 = pnand %p814_p2, %p1072_p9  ;;  %p820_p12 = scmp.lt.u32.totalorder %s818_s29, %s813_s18 }
  0x63   : > { %p822_p3 = scmp.lt.u32.totalorder %s813_s18, %s1117_s15 }
  0x64   : > { %p817_p8 = pneg %p816_p7  ;;  %p821_p1 = por %p820_p12, %p819_p10 }
  0x66   : > { %p823_p6 = por %p822_p3, %p821_p1 }
  0x68   : > { %p824_p13 = pnand %p823_p6, %p817_p8 }
  0x6a   : > { %827 = shalt.err (!%p824_p13)
}
  0x6b   : > { %s828_s2 = scalar_lea.vmem %s229_s27, 128  ;;  %s936_s10 = smov [#allocation12]  }
  0x6c   : > { %p829_p0 = scmp.ne.s32.totalorder %s229_s27, %s828_s2  ;;  %s833_s13 = sshll.u32 %s936_s10, 4  ;;  %s834_s13 = int_to_ptr.vmem [resolvable:$false] %s833_s13 }
  0x6d   : > { %s835_s30 = scalar_lea.vmem %s834_s13, 256  ;;  %p836_p2 = scmp.lt.s32.totalorder %s229_s27, %s834_s13 }
  0x6e   : > { %p831_p11 = pnand %p829_p0, %p1072_p9  ;;  %p837_p7 = scmp.lt.s32.totalorder %s835_s30, %s828_s2 }
  0x70   : > { %p832_p4 = pneg %p831_p11  ;;  %p838_p5 = por %p837_p7, %p836_p2 }
  0x72   : > { %p839_p10 = pnand %p838_p5, %p832_p4 }
  0x74   : > { %842 = shalt.err (!%p839_p10)
}
  0x75   : > { %p1279_p12 = scmp.ne.s32.totalorder %s1273_s12, 0  ;;  %p1280_p8 = scmp.ne.s32.totalorder %s1278_s26, 0 }
  0x76   : > { %s1164_s28 = sand.u32 (!%p1280_p8), 1, %s915_s20   ;;  %p1281_p5 = scmp.ne.s32.totalorder (!%p1280_p8), %s1269_s5, 0 }
  0x77   : > { %670 = dma.hbm_to_vmem [thread:$0]  (!%p1279_p12), %s1117_s15, 128, %s229_s27, %s1066_s19  }
  0x78   : > { %237 = sbr.rel (%p1280_p8) target bundleno = 1025 (0x401), region = 32  ;;  %s1167_s16 = sshll.u32 (!%p1280_p8), %s1164_s28, 3 }
  0x79   : > { %s240_s7 = scalar_lea.sflag (!%p1280_p8), [#allocation8], %s1164_s28  ;;  %s243_s23 = scalar_lea.vmem (!%p1280_p8), [#allocation7], %s1167_s16 }
  0x7f   : > { %898 = dma.done.wait (%p1281_p5), %s240_s7, 128  }
  0x80   : > { %900 = vsyncadd (%p1281_p5), %s240_s7, 4294967168  ;;  %s248_s12 = sand.u32 1, %s1003_s25   ;;  %s252_s26 = scalar_lea.vmem [#allocation10], %s1167_s16 }
  0x81   : > { %s249_s19 = scalar_lea.sflag [#allocation11], %s248_s12 }
  0x82   : > { %902 = dma.done.wait (%p1281_p5), %s249_s19, 256  }
  0x83   : > { %904 = vsyncadd (%p1281_p5), %s249_s19, 4294967040  ;;  %vm299_vm0 = vcmask 7168   ;;  %s304_s15 = sld [smem:[#allocation6 + %s923_s22]]  ;;  %v937_v0 = vmov -inf   ;;  %v938_v1 = vmov 0.0   ;;  %vm302_vm1 = vcmask 261120  }
  0x84   : > { %300 = vst.msk [vmem:[#allocation2] sm:$0xff] %vm299_vm0, %v937_v0  ;;  %301 = vst.msk [vmem:[#allocation3] sm:$0xff] %vm299_vm0, %v938_v1  ;;  %s261_s25 = scalar_lea.vmem [#allocation12], %s1167_s16  ;;  %s293_s27 = scalar_lea.vmem [#allocation13], %s1167_s16 }
  0x85   : > { %303 = vst.msk [vmem:[#allocation4] sm:$0xff] %vm302_vm1, %v938_v1 }
  0x89   : > { %p630_p9 = scmp.le.s32.totalorder %s304_s15, 0 }
  0x8a   : > { %v313_v2 = vld [vmem:[%s252_s26] sm:$0xff] (!%p630_p9)  ;;  %v310_v3 = vld [vmem:[%s243_s23] sm:$0xff] (!%p630_p9)  ;;  %v939_v4 = vmov (!%p630_p9), 0.0   ;;  %vm940_vm2 = vmmov (!%p630_p9), 0   ;;  %v364_v9 = vlaneseq (!%p630_p9)  ;;  %v368_v11 = vstv (!%p630_p9), %s304_s15 }
  0x8b   : > { %309 = sbr.rel (%p630_p9) target bundleno = 867 (0x363), region = 52  ;;  %641 = vmatprep.subr.bf16.mxu0 (!%p630_p9), %v939_v4  ;;  %v314_v5 = vpack.c.bf16 (!%p630_p9), %v313_v2, %v313_v2  ;;  %643 = vmatprep.mubr.msk.bf16.mxu0 (!%p630_p9), %vm940_vm2, %v939_v4  ;;  %v311_v7 = vmul.f32 (!%p630_p9), 0.17677669, %v310_v3  ;;  %vm372_vm4 = vcmask (!%p630_p9), 64512   ;;  %v941_v18 = vmov (!%p630_p9), 0   ;;  %v371_v19 = vld [vmem:[#allocation2] sm:$0xff] (!%p630_p9) }
  0x8c   : > { %647 = vmatprep.subr.bf16.mxu1 (!%p630_p9), %v939_v4  ;;  %649 = vmatprep.mubr.msk.bf16.mxu1 (!%p630_p9), %vm940_vm2, %v939_v4  ;;  %v365_v10 = vand.u32 (!%p630_p9), 127, %v364_v9  ;;  %v315_v23 = vld [vmem:[%s261_s25] sm:$0xff] (!%p630_p9)  ;;  %vm407_vm5 = vcmask (!%p630_p9), 1043456   ;;  %v388_v34 = vld [vmem:[#allocation3] sm:$0xff] (!%p630_p9)  ;;  %v396_v38 = vld [vmem:[#allocation4] sm:$0xff] (!%p630_p9) }
  0x8d   : > { %v322_v6 = vsel (!%p630_p9), %vm302_vm1, %v314_v5, 0  ;;  %v312_v8 = vpack.c.bf16 (!%p630_p9), %v311_v7, %v311_v7  ;;  %732 = vset.pattern.permute.xlu0 (!%p630_p9), %v941_v18  ;;  %733 = vset.pattern.permute.xlu1 (!%p630_p9), %v941_v18  ;;  %v316_v24 = vpack.c.bf16 (!%p630_p9), %v315_v23, %v315_v23 }
  0x8e   : > { %642 = vmatpush3.bf16.xpose.msra.mxu0 (!%p630_p9), %v322_v6  ;;  %vm369_vm3 = vcmp.lt.s32.totalorder (!%p630_p9), %v365_v10, %v368_v11 }
  0x8f   : > { %v409_v25 = vsel (!%p630_p9), %vm407_vm5, %v316_v24, 0 }
  0x90   : > { %648 = vmatpush3.bf16.msra.mxu1 (!%p630_p9), %v409_v25 }
  0x95   : > { %644 = vmatmul.mubr.msk.bf16.vlgmr.msra.gmra.mrb[0].mxu0 %vm302_vm1, %v312_v8 }
 0x168   : > { %v358_v12 = vpop.f32.mrb[0].mxu0 }
 0x169   : > { %v370_v13 = vsel %vm369_vm3, %v358_v12, -1e+30  ;;  %v645_v14 = vpop.f32.mrb[1].mxu0 }
 0x16a   : > { %v361_v15 = vpop.f32.mrb[2].mxu0  ;;  %v373_v16 = vsel %vm372_vm4, %v370_v13, -inf }
 0x16b   : > { %374 = vmax.xlane.f32.xlu0 %v373_v16  ;;  %v646_v17 = vpop.f32.mrb[3].mxu0 }
 0x1f8   : > { %v375_v20 = vpop.xlane.xlu0 %374 }
 0x1f9   : > { %v376_v21 = vmax.f32 %v371_v19, %v375_v20 }
 0x1fb   : > { %v377_v22 = vsub.f32 %v371_v19, %v376_v21  ;;  %453 = vst.msk [vmem:[#allocation2] sm:$0xff] %vm299_vm0, %v376_v21  ;;  %382 = vperm.xlu0 %732, %v376_v21  }
 0x1fd   : > { %v378_v32 = vmul.f32 1.442695, %v377_v22 }
 0x27a   : > { %v383_v26 = vpop.permute.xlu0 %382 }
 0x27b   : > { %v385_v27 = vsub.f32 %v370_v13, %v383_v26 }
 0x27d   : > { %v386_v28 = vmul.f32 1.442695, %v385_v27 }
 0x27f   : > { %734 = vpow2.f32 %v386_v28 }
 0x280   : > { %736 = vpow2.f32 %v378_v32 }
 0x289   : > { %v735_v29 = vpop.eup %734 }
 0x28a   : > { %v390_v30 = vsel %vm372_vm4, %v735_v29, 0.0  ;;  %v403_v31 = vpack.c.bf16 %v735_v29, %v735_v29  ;;  %v737_v33 = vpop.eup %736 }
 0x28b   : > { %391 = vadd.xlane.f32.xlu1 %v390_v30  ;;  %v389_v35 = vmul.f32 %v737_v33, %v388_v34 }
 0x28c   : > { %650 = vmatmul.mubr.msk.bf16.vlgmr.msra.gmra.mrb[0].mxu1 %vm372_vm4, %v403_v31 }
 0x29c   : > { %399 = vperm.xlu1 %733, %v737_v33  }
 0x318   : > { %v392_v36 = vpop.xlane.xlu1 %391 }
 0x319   : > { %v393_v37 = vadd.f32 %v392_v36, %v389_v35 }
 0x31b   : > { %395 = vst.msk [vmem:[#allocation3] sm:$0xff] %vm299_vm0, %v393_v37 }
 0x31c   : > { %v400_v39 = vpop.permute.xlu1 %399 }
 0x31d   : > { %v402_v40 = vmul.f32 %v400_v39, %v396_v38 }
 0x35f   : > { %v445_v41 = vpop.f32.mrb[0].mxu1 }
 0x360   : > { %v451_v42 = vadd.f32 %v445_v41, %v402_v40  ;;  %v651_v43 = vpop.f32.mrb[1].mxu1 }
 0x361   : > { %v448_v44 = vpop.f32.mrb[2].mxu1 }
 0x362   : > { %452 = vst.msk [vmem:[#allocation4] sm:$0xff] %vm302_vm1, %v451_v42  ;;  %v652_v45 = vpop.f32.mrb[3].mxu1 }
 0x363 PF: > { %v457_v46 = vld [vmem:[#allocation3] sm:$0xff]  ;;  %v942_v47 = vmov 0   ;;  %s634_s5 = sshll.u32 %s923_s22, 7  ;;  %s486_s18 = sshll.u32 %s293_s27, 4  ;;  %s1205_s18 = int_to_ptr.vmem [resolvable:$true] %s486_s18 }
 0x364   : > { %738 = vset.pattern.permute.xlu0 %v942_v47  ;;  %vm458_vm6 = vcmp.gt.f32.partialorder %v457_v46, 0.0  ;;  %s1203_s29 = scalar_lea.hbm %s1259_s4, %s634_s5  ;;  %s472_s9 = scalar_lea.sflag [#allocation9], %s1164_s28 }
 0x365   : > { %v459_v48 = vsel %vm458_vm6, %v457_v46, 1.0  ;;  %s843_s11 = scalar_lea.vmem %s1205_s18, 128  ;;  %p1282_p3 = scmp.ne.s32.totalorder %s1270_s6, 0 }
 0x366   : > { %739 = vrcp.f32 %v459_v48  ;;  %p844_p1 = scmp.ne.s32.totalorder %s1205_s18, %s843_s11  ;;  %s943_s22 = smov [#allocation13]  }
 0x367   : > { %s847_s2 = sshll.u32 %s943_s22, 4  ;;  %s848_s2 = int_to_ptr.vmem [resolvable:$false] %s847_s2 }
 0x368   : > { %p845_p6 = pnand %p844_p1, %p1282_p3  ;;  %s849_s10 = scalar_lea.vmem %s848_s2, 256 }
 0x369   : > { %v462_v50 = vld [vmem:[#allocation4] sm:$0xff]  ;;  %p850_p0 = scmp.lt.s32.totalorder %s1205_s18, %s848_s2  ;;  %p851_p11 = scmp.lt.s32.totalorder %s849_s10, %s843_s11 }
 0x36a   : > { %p846_p13 = pneg %p845_p6 }
 0x36b   : > { %p852_p4 = por %p851_p11, %p850_p0 }
 0x36d   : > { %p853_p2 = pnand %p852_p4, %p846_p13 }
 0x370   : > { %v740_v49 = vpop.eup %739 }
 0x371   : > { %465 = vperm.xlu0 %738, %v740_v49  }
 0x3f0   : > { %v466_v51 = vpop.permute.xlu0 %465 }
 0x3f1   : > { %v468_v52 = vmul.f32 %v466_v51, %v462_v50 }
 0x3f3   : > { %470 = vst.msk [vmem:[%s293_s27] sm:$0xff] %vm302_vm1, %v468_v52 }
 0x3f4   : > { %856 = shalt.err (!%p853_p2)
}
 0x3f5   : > { %s857_s13 = scalar_lea.hbm %s1203_s29, 128  ;;  %s861_s16 = scalar_lea.hbm %s1259_s4, 256 }
 0x3f6   : > { %p858_p7 = scmp.ne.s32.totalorder %s1203_s29, %s857_s13  ;;  %p862_p8 = scmp.lt.u32.totalorder %s1203_s29, %s1259_s4 }
 0x3f7   : > { %p863_p5 = scmp.lt.u32.totalorder %s861_s16, %s857_s13  ;;  %p865_p1 = scmp.lt.u32.totalorder %s857_s13, %s1203_s29 }
 0x3f8   : > { %p859_p10 = pnand %p858_p7, %p1282_p3 }
 0x3f9   : > { %p864_p9 = por %p863_p5, %p862_p8 }
 0x3fa   : > { %p860_p12 = pneg %p859_p10 }
 0x3fb   : > { %p866_p6 = por %p865_p1, %p864_p9 }
 0x3fd   : > { %p867_p13 = pnand %p866_p6, %p860_p12 }
 0x3ff   : > { %870 = shalt.err (!%p867_p13)
}
 0x400   : > { %659 = dma.vmem_to_hbm [thread:$0]  (%p1282_p3), %s1205_s18, 128, %s1203_s29, %s472_s9  }
 0x401 PF: > { %s498_s12 = sand.u32 1, %s911_s0   ;;  %p1283_p0 = scmp.ne.s32.totalorder %s1272_s8, 0 }
 0x402   : > { %p1284_p11 = scmp.ge.s32.totalorder %s931_s24, 2  ;;  %s499_s19 = scalar_lea.sflag [#allocation9], %s498_s12 }
 0x404   : > { %p672_p4 = pnand %p1284_p11, %p1283_p0 }
 0x406   : > { %906 = dma.done.wait (!%p672_p4), %s499_s19, 128  }
 0x407   : > { %908 = vsyncadd (!%p672_p4), %s499_s19, 4294967168  ;;  %s29_s24 = sadd.s32 1, %s931_s24   ;;  %s1285_s6 = sld [smem:[#allocation20_spill]] }
 0x408   : > { %p26_p2 = scmp.ge.s32.totalorder %s29_s24, 4   ;;  %s1286_s22 = sld [smem:[#allocation18_spill]] }
 0x409   : > { %s1287_s23 = sld [smem:[#allocation19_spill]]  ;;  %s1288_s0 = smov %s915_s20 }
 0x40a   : > { %s1289_s20 = smov %s919_s21  ;;  %28 = sbr.rel (!%p26_p2) target bundleno = 23 (0x17), region = 113 }
 0x40d   : > { %s1290_s21 = smov %s1285_s6 }
 0x411   :  { %504 = vsyncpa [#allocation8], 1 }
 0x412   :  { %506 = vsyncpa [#allocation8 + $0x1], 1 }
 0x413   :  { %507 = vsyncpa [#allocation11], 1 }
 0x414   :  { %509 = vsyncpa [#allocation11 + $0x1], 1 }
 0x415   :  { %510 = vsyncpa [#allocation9], 1 }
 0x416   :  { %512 = vsyncpa [#allocation9 + $0x1], 1 }

</bundles_post_ra>
